<compile_context>
chip_gen: v6e
topology: v6e:2x2x1
jax: 0.10.0
libtpu: 0.0.40
codegen_flags: <defaults>
</compile_context>

<pallas_src>
import functools

import jax
import jax.numpy as jnp
from jax.experimental import pallas as pl
from jax.experimental.pallas import tpu as pltpu

_EPS = 1e-5


def _vmem_capacity_bytes() -> int:
    """Per-chip VMEM capacity; conservative fallback if the query fails."""
    try:
        info = pltpu.get_tpu_info()
        cap = getattr(info, "vmem_capacity_bytes", None)
        if cap:
            return int(cap)
    except Exception:
        pass
    return 64 << 20  # v7x-sized fallback; v5e/v6e have 128 MiB


def _kernel_rows(prior_ref, input_ref, out_ref, acc_ref, *, n_rows, tile_n, steps):
    """(rows, C) layout: softmax / reductions over the lane (class) axis."""
    c = pl.program_id(0)
    i = pl.program_id(1)

    @pl.when(i == 0)
    def _init():
        acc_ref[...] = jnp.zeros_like(acc_ref)

    x = input_ref[...].astype(jnp.float32)   # (tile_n, C) raw logits
    p = prior_ref[...].astype(jnp.float32)   # (tile_n, C) prior (not softmaxed)

    # Numerically-stable softmax with the epsilon-log folded algebraically:
    #   log(e/denom + eps) = log(e + eps*denom) - log(denom)
    # TODO(synk): if the bf16 path ever becomes EUP-bound on v7x, do the exp()
    # in bf16 (keep log/denom in f32); v5e must stay f32 (no bf16 EUP).
    m = jnp.max(x, axis=1, keepdims=True)
    e = jnp.exp(x - m)
    denom = jnp.sum(e, axis=1, keepdims=True)
    log_q_eps = jnp.log(e + jnp.float32(_EPS) * denom) - jnp.log(denom)
    row_sum = jnp.sum(-p * log_q_eps, axis=1, keepdims=True)     # (tile_n, 1)

    # Per-row mask built from the *logical* tile index: covers the ragged last
    # tile and whole tiles past the end when total_tiles % cores != 0
    # (such tiles are clamped to a valid block by the index_map).
    t = c * steps + i
    row_ids = t * tile_n + jax.lax.broadcasted_iota(jnp.int32, (tile_n, 1), 0)
    row_sum = jnp.where(row_ids < n_rows, row_sum, 0.0)

    acc_ref[...] += row_sum   # vector partial; no per-step scalar collapse

    @pl.when(i == steps - 1)
    def _finalize():
        partial = jnp.sum(acc_ref[...]) / jnp.float32(n_rows)
        out_ref[...] = jnp.full(out_ref.shape, partial, dtype=out_ref.dtype)


def _kernel_ncd(prior_ref, input_ref, out_ref, acc_ref, *,
                n_obs, d_total, tile_d, steps, d_tiles, total_tiles):
    """(N, C, D) layout: softmax over the class (sublane) axis, tiled over D."""
    c = pl.program_id(0)
    i = pl.program_id(1)

    @pl.when(i == 0)
    def _init():
        acc_ref[...] = jnp.zeros_like(acc_ref)

    x = input_ref[0].astype(jnp.float32)   # (C, tile_d)
    p = prior_ref[0].astype(jnp.float32)

    m = jnp.max(x, axis=0, keepdims=True)
    e = jnp.exp(x - m)
    denom = jnp.sum(e, axis=0, keepdims=True)
    log_q_eps = jnp.log(e + jnp.float32(_EPS) * denom) - jnp.log(denom)
    col_sum = jnp.sum(-p * log_q_eps, axis=0, keepdims=True)     # (1, tile_d)

    t = c * steps + i
    d_ids = (t % d_tiles) * tile_d + jax.lax.broadcasted_iota(jnp.int32, (1, tile_d), 1)
    valid = jnp.logical_and(t < total_tiles, d_ids < d_total)
    col_sum = jnp.where(valid, col_sum, 0.0)

    acc_ref[...] += col_sum

    @pl.when(i == steps - 1)
    def _finalize():
        partial = jnp.sum(acc_ref[...]) / jnp.float32(n_obs)
        out_ref[...] = jnp.full(out_ref.shape, partial, dtype=out_ref.dtype)


def distillation_loss(prior: jax.Array, inp: jax.Array, *,
                      tile_n=None, tile_d=None) -> jax.Array:
    """prior, inp: (N, C) or (N, C, d1, ..., dK) float arrays. Returns scalar f32."""
    assert prior.shape == inp.shape, "prior and input must have the same shape"
    assert inp.ndim >= 2, "expect (N, C) or (N, C, d1, ..., dK)"

    p_isz = jnp.dtype(prior.dtype).itemsize
    i_isz = jnp.dtype(inp.dtype).itemsize
    C = inp.shape[1]

    vmem_cap = _vmem_capacity_bytes()
    budget = int(vmem_cap * 0.55)      # pipeline buffers + f32 temporaries
    # Per row/lane-column of a tile: 2 pipeline buffers per input plus ~6
    # full-tile f32 temporaries the kernel materializes (x, p, e, log_q_eps, ...).
    per_line = 2 * C * (p_isz + i_isz) + 6 * C * 4

    if inp.ndim == 2:
        # ---------- (N, C): class axis on lanes ----------
        N = inp.shape[0]
        if tile_n is None:
            mult = 8 * max(1, 4 // min(p_isz, i_isz))   # 8 f32 / 16 bf16 / 32 int8
            tile_n = max(mult, min(4096, budget // max(per_line, 1)))
            tile_n = (tile_n // mult) * mult
        if N <= tile_n:
            tile_n = N                                   # full-dim block always legal
        else:
            assert tile_n % 8 == 0, "tile_n must be a multiple of 8"
        # TODO(synk): C < 128 is lane-starved (e.g. C=16 uses 16/128 lanes);
        # packing 128//C rows per lane row with segmented reductions would
        # restore occupancy for small-C, compute-bound shapes.
        # TODO(synk): vocab-scale C where even the minimum tile blows the VMEM
        # budget needs a trailing class-axis grid with two-pass max/denom.

        total_tiles = pl.cdiv(N, tile_n)
        cores = min(2, total_tiles)        # v7x has 2 TCs; free on 1-TC chips
        steps = pl.cdiv(total_tiles, cores)

        def in_map(c, i):
            return (jnp.minimum(c * steps + i, total_tiles - 1), 0)

        kernel = functools.partial(_kernel_rows, n_rows=N, tile_n=tile_n, steps=steps)
        block = (tile_n, C)
        in_specs = [pl.BlockSpec(block, in_map), pl.BlockSpec(block, in_map)]
        scratch = [pltpu.VMEM((tile_n, 1), jnp.float32)]
        block_elems = tile_n * C
        n_elems = N * C
        args = (prior, inp)
    else:
        # ---------- (N, C, d1..dK): zero-copy reshape to (N, C, D) ----------
        # No wrapper transpose (which would round-trip both tensors through
        # HBM); the kernel reduces over the class (sublane) axis instead.
        N = inp.shape[0]
        D = 1
        for d in inp.shape[2:]:
            D *= d
        prior3 = prior.reshape(N, C, D)
        inp3 = inp.reshape(N, C, D)

        if tile_d is None:
            td = budget // max(per_line, 1)
            if td >= D:
                tile_d = D
            else:
                tile_d = max(128, (td // 128) * 128)
                # TODO(synk): vocab-scale C can exceed the VMEM budget even at
                # 128 lanes; add a class-axis grid with two-pass max/denom.
        if D <= tile_d:
            tile_d = D                                   # full-dim block always legal
        else:
            assert tile_d % 128 == 0, "tile_d must be a multiple of 128"

        d_tiles = pl.cdiv(D, tile_d)
        total_tiles = N * d_tiles
        cores = min(2, total_tiles)
        steps = pl.cdiv(total_tiles, cores)

        def in_map(c, i):
            t = jnp.minimum(c * steps + i, total_tiles - 1)
            return (t // d_tiles, 0, t % d_tiles)

        kernel = functools.partial(_kernel_ncd, n_obs=N * D, d_total=D,
                                   tile_d=tile_d, steps=steps, d_tiles=d_tiles,
                                   total_tiles=total_tiles)
        block = (1, C, tile_d)
        in_specs = [pl.BlockSpec(block, in_map), pl.BlockSpec(block, in_map)]
        scratch = [pltpu.VMEM((1, tile_d), jnp.float32)]
        block_elems = C * tile_d
        n_elems = N * C * D
        args = (prior3, inp3)

    # VMEM limit: double-buffered input blocks + full-tile f32 temps + margin,
    # clamped under the physical per-chip capacity (64 MiB on v7x).
    vmem_limit = 2 * block_elems * (p_isz + i_isz) + 6 * block_elems * 4 + (4 << 20)
    vmem_limit = max(16 << 20, min(vmem_limit, vmem_cap - (8 << 20)))

    out = pl.pallas_call(
        kernel,
        out_shape=jax.ShapeDtypeStruct((cores, 8, 128), jnp.float32),
        grid=(cores, steps),
        in_specs=in_specs,
        out_specs=pl.BlockSpec((1, 8, 128), lambda c, i: (c, 0, 0)),
        scratch_shapes=scratch,
        compiler_params=pltpu.CompilerParams(
            dimension_semantics=("parallel", "arbitrary"),
            vmem_limit_bytes=int(vmem_limit),
        ),
        cost_estimate=pl.CostEstimate(
            flops=6 * n_elems,
            transcendentals=2 * n_elems,
            bytes_accessed=n_elems * (p_isz + i_isz) + cores * 8 * 128 * 4,
        ),
    )(*args)

    # Per-core partials already carry the 1/n_obs factor; summing the (<=2)
    # partials finishes the mean.
    return jnp.sum(out[:, 0, 0])


def _reference(prior, inp):
    # Pure-JAX reference mirroring the PyTorch module (any ndim >= 2).
    q = jax.nn.softmax(inp.astype(jnp.float32), axis=1)
    return jnp.mean(jnp.sum(-prior.astype(jnp.float32) * jnp.log(q + 1e-5), axis=1))


if __name__ == "__main__":
    key = jax.random.PRNGKey(0)
    k1, k2, k3, k4, k5, k6, k7, k8 = jax.random.split(key, 8)

    # Small (N, C) case matching the module's (minibatch, C) signature.
    N, C = 8, 16
    prior = jax.random.normal(k1, (N, C), dtype=jnp.float32)
    inp = jax.random.normal(k2, (N, C), dtype=jnp.float32)
    loss = distillation_loss(prior, inp)
    jax.block_until_ready(loss)
    ref = _reference(prior, inp)
    assert jnp.allclose(loss, ref, atol=1e-4, rtol=1e-4), (loss, ref)

    # Multi-tile, 2-core grid + ragged last tile (exercises masking, the
    # clamped out-of-range tile on core 1, and per-core partials).
    N2, C2 = 20, 256
    prior2 = jax.random.normal(k3, (N2, C2), dtype=jnp.float32)
    inp2 = jax.random.normal(k4, (N2, C2), dtype=jnp.float32)
    loss2 = distillation_loss(prior2, inp2, tile_n=8)
    jax.block_until_ready(loss2)
    ref2 = _reference(prior2, inp2)
    assert jnp.allclose(loss2, ref2, atol=1e-4, rtol=1e-4), (loss2, ref2)

    # bf16 inputs (halves DMA bytes for this memory-bound kernel).
    loss3 = distillation_loss(prior2.astype(jnp.bfloat16), inp2.astype(jnp.bfloat16),
                              tile_n=16)
    jax.block_until_ready(loss3)
    ref3 = _reference(prior2.astype(jnp.bfloat16), inp2.astype(jnp.bfloat16))
    assert jnp.allclose(loss3, ref3, atol=5e-2, rtol=5e-2), (loss3, ref3)

    # K-dimensional case (N, C, d1, d2): zero-copy reshape, class axis on
    # sublanes, no wrapper transpose through HBM.
    prior4 = jax.random.normal(k5, (2, 4, 16, 16), dtype=jnp.float32)
    inp4 = jax.random.normal(k6, (2, 4, 16, 16), dtype=jnp.float32)
    loss4 = distillation_loss(prior4, inp4)
    jax.block_until_ready(loss4)
    ref4 = _reference(prior4, inp4)
    assert jnp.allclose(loss4, ref4, atol=1e-4, rtol=1e-4), (loss4, ref4)

    # K-dimensional case with a ragged lane tile (D = 160, tile_d = 128).
    prior5 = jax.random.normal(k7, (2, 4, 16, 10), dtype=jnp.float32)
    inp5 = jax.random.normal(k8, (2, 4, 16, 10), dtype=jnp.float32)
    loss5 = distillation_loss(prior5, inp5, tile_d=128)
    jax.block_until_ready(loss5)
    ref5 = _reference(prior5, inp5)
    assert jnp.allclose(loss5, ref5, atol=1e-4, rtol=1e-4), (loss5, ref5)

    print("KERNEL_OK")
</pallas_src>

<mosaic_0001>
module attributes {stable_mosaic.version = 11 : i64} {
  func.func @_kernel_rows(%arg0: i32, %arg1: i32, %arg2: memref<8x16xf32, #tpu.memory_space<vmem>>, %arg3: memref<8x16xf32, #tpu.memory_space<vmem>>, %arg4: memref<1x8x128xf32, #tpu.memory_space<vmem>>, %arg5: memref<8x1xf32, #tpu.memory_space<vmem>>) attributes {dimension_semantics = [#tpu.dimension_semantics<parallel>, #tpu.dimension_semantics<arbitrary>], iteration_bounds = array<i64: 1, 1>, scalar_prefetch = 0 : i64, scratch_operands = 1 : i64, tpu.core_type = #tpu.core_type<tc>, window_params = [{transform_indices = @transform_0, window_bounds = array<i64: 8, 16>}, {transform_indices = @transform_1, window_bounds = array<i64: 8, 16>}, {transform_indices = @transform_2, window_bounds = array<i64: 1, 8, 128>}]} {
    %c0_i32 = arith.constant 0 : i32
    %0 = arith.cmpi eq, %arg1, %c0_i32 : i32
    %1 = arith.extui %0 : i1 to i32
    %c0_i32_0 = arith.constant 0 : i32
    %2 = arith.cmpi ne, %1, %c0_i32_0 : i32
    scf.if %2 {
      %cst_16 = arith.constant 0.000000e+00 : f32
      %41 = vector.broadcast %cst_16 : f32 to vector<8x1xf32>
      %c0_17 = arith.constant 0 : index
      %c0_18 = arith.constant 0 : index
      %42 = vector.load %arg5[%c0_17, %c0_18] : memref<8x1xf32, #tpu.memory_space<vmem>>, vector<8x1xf32>
      tpu.vector_store %arg5[%c0_17, %c0_18], %41 {strides = array<i32>} : memref<8x1xf32, #tpu.memory_space<vmem>>, vector<8x1xf32>,
    } else {
    }
    %c0 = arith.constant 0 : index
    %c0_1 = arith.constant 0 : index
    %3 = vector.load %arg3[%c0, %c0_1] : memref<8x16xf32, #tpu.memory_space<vmem>>, vector<8x16xf32>
    %c0_2 = arith.constant 0 : index
    %c0_3 = arith.constant 0 : index
    %4 = vector.load %arg2[%c0_2, %c0_3] : memref<8x16xf32, #tpu.memory_space<vmem>>, vector<8x16xf32>
    %cst = arith.constant dense<0xFF800000> : vector<8xf32>
    %5 = vector.multi_reduction <maximumf>, %3, %cst [1] : vector<8x16xf32> to vector<8xf32>
    %6 = vector.shape_cast %5 : vector<8xf32> to vector<8x1xf32>
    %7 = vector.broadcast %6 : vector<8x1xf32> to vector<8x16xf32>
    %8 = arith.subf %3, %7 : vector<8x16xf32>
    %9 = math.exp %8 : vector<8x16xf32>
    %cst_4 = arith.constant dense<0.000000e+00> : vector<8xf32>
    %10 = vector.multi_reduction <add>, %9, %cst_4 [1] : vector<8x16xf32> to vector<8xf32>
    %11 = vector.shape_cast %10 : vector<8xf32> to vector<8x1xf32>
    %cst_5 = arith.constant 9.99999974E-6 : f32
    %12 = vector.broadcast %cst_5 : f32 to vector<8x1xf32>
    %13 = arith.mulf %12, %11 : vector<8x1xf32>
    %14 = vector.broadcast %13 : vector<8x1xf32> to vector<8x16xf32>
    %15 = arith.addf %9, %14 : vector<8x16xf32>
    %16 = math.log %15 : vector<8x16xf32>
    %17 = math.log %11 : vector<8x1xf32>
    %18 = vector.broadcast %17 : vector<8x1xf32> to vector<8x16xf32>
    %19 = arith.subf %16, %18 : vector<8x16xf32>
    %cst_6 = arith.constant 0.000000e+00 : f32
    %20 = vector.broadcast %cst_6 : f32 to vector<8x16xf32>
    %21 = arith.subf %20, %4 : vector<8x16xf32>
    %22 = arith.mulf %21, %19 : vector<8x16xf32>
    %cst_7 = arith.constant dense<0.000000e+00> : vector<8xf32>
    %23 = vector.multi_reduction <add>, %22, %cst_7 [1] : vector<8x16xf32> to vector<8xf32>
    %24 = vector.shape_cast %23 : vector<8xf32> to vector<8x1xf32>
    %c1_i32 = arith.constant 1 : i32
    %25 = arith.muli %arg0, %c1_i32 : i32
    %26 = arith.addi %25, %arg1 : i32
    %c8_i32 = arith.constant 8 : i32
    %27 = arith.muli %26, %c8_i32 : i32
    %28 = tpu.iota {dimensions = array<i32: 0>} : vector<8x1xi32>
    %29 = vector.broadcast %27 : i32 to vector<8x1xi32>
    %30 = arith.addi %29, %28 : vector<8x1xi32>
    %c8_i32_8 = arith.constant 8 : i32
    %31 = vector.broadcast %c8_i32_8 : i32 to vector<8x1xi32>
    %32 = arith.cmpi slt, %30, %31 : vector<8x1xi32>
    %cst_9 = arith.constant 0.000000e+00 : f32
    %33 = vector.broadcast %cst_9 : f32 to vector<8x1xf32>
    %34 = arith.select %32, %24, %33 : vector<8x1xi1>, vector<8x1xf32>
    %c0_10 = arith.constant 0 : index
    %c0_11 = arith.constant 0 : index
    %35 = vector.load %arg5[%c0_10, %c0_11] : memref<8x1xf32, #tpu.memory_space<vmem>>, vector<8x1xf32>
    %36 = arith.addf %35, %34 : vector<8x1xf32>
    %c0_12 = arith.constant 0 : index
    %c0_13 = arith.constant 0 : index
    %37 = vector.load %arg5[%c0_12, %c0_13] : memref<8x1xf32, #tpu.memory_space<vmem>>, vector<8x1xf32>
    tpu.vector_store %arg5[%c0_12, %c0_13], %36 {strides = array<i32>} : memref<8x1xf32, #tpu.memory_space<vmem>>, vector<8x1xf32>,
    %c0_i32_14 = arith.constant 0 : i32
    %38 = arith.cmpi eq, %arg1, %c0_i32_14 : i32
    %39 = arith.extui %38 : i1 to i32
    %c0_i32_15 = arith.constant 0 : i32
    %40 = arith.cmpi ne, %39, %c0_i32_15 : i32
    scf.if %40 {
      %c0_16 = arith.constant 0 : index
      %c0_17 = arith.constant 0 : index
      %41 = vector.load %arg5[%c0_16, %c0_17] : memref<8x1xf32, #tpu.memory_space<vmem>>, vector<8x1xf32>
      %42 = vector.shape_cast %41 : vector<8x1xf32> to vector<1x8x1xf32>
      %cst_18 = arith.constant dense<0.000000e+00> : vector<1xf32>
      %43 = vector.multi_reduction <add>, %42, %cst_18 [1, 2] : vector<1x8x1xf32> to vector<1xf32>
      %44 = vector.shape_cast %43 : vector<1xf32> to vector<1x1x1xf32>
      %45 = vector.extract %44[0, 0, 0] : f32 from vector<1x1x1xf32>
      %cst_19 = arith.constant 8.000000e+00 : f32
      %46 = arith.divf %45, %cst_19 : f32
      %47 = vector.broadcast %46 : f32 to vector<1x8x128xf32>
      %c0_20 = arith.constant 0 : index
      %c0_21 = arith.constant 0 : index
      %c0_22 = arith.constant 0 : index
      %48 = vector.load %arg4[%c0_20, %c0_21, %c0_22] : memref<1x8x128xf32, #tpu.memory_space<vmem>>, vector<1x8x128xf32>
      tpu.vector_store %arg4[%c0_20, %c0_21, %c0_22], %47 {strides = array<i32>} : memref<1x8x128xf32, #tpu.memory_space<vmem>>, vector<1x8x128xf32>,
    } else {
    }
    return
  }
  func.func @transform_0(%arg0: i32, %arg1: i32) -> (i32, i32) {
    %c1_i32 = arith.constant 1 : i32
    %0 = arith.muli %arg0, %c1_i32 : i32
    %1 = arith.addi %0, %arg1 : i32
    %c0_i32 = arith.constant 0 : i32
    %2 = arith.minsi %1, %c0_i32 : i32
    %c0_i32_0 = arith.constant 0 : i32
    %c0_i32_1 = arith.constant 0 : i32
    return %2, %c0_i32_0 : i32, i32
  }
  func.func @transform_1(%arg0: i32, %arg1: i32) -> (i32, i32) {
    %c1_i32 = arith.constant 1 : i32
    %0 = arith.muli %arg0, %c1_i32 : i32
    %1 = arith.addi %0, %arg1 : i32
    %c0_i32 = arith.constant 0 : i32
    %2 = arith.minsi %1, %c0_i32 : i32
    %c0_i32_0 = arith.constant 0 : i32
    %c0_i32_1 = arith.constant 0 : i32
    return %2, %c0_i32_0 : i32, i32
  }
  func.func @transform_2(%arg0: i32, %arg1: i32) -> (i32, i32, i32) {
    %c0_i32 = arith.constant 0 : i32
    %c0_i32_0 = arith.constant 0 : i32
    %c0_i32_1 = arith.constant 0 : i32
    return %arg0, %c0_i32, %c0_i32_0 : i32, i32, i32
  }
}

</mosaic_0001>

<bundles_post_ra>
// kernel: tpu_custom_call.1
= control target key start
LH: loop header
LB: loop body
LE: loop exit
PB: predicated region body
PF: predicated region fallthrough
CT: control target
= control target key end

     0   :  { %7 = vsyncpa [#allocation4], 0  ;;  %s245_s0 = inlined_call_operand.hbm [shape: f32[8,16], index: 0, kind: input, shape index: {}]   ;;  %s246_s1 = inlined_call_operand.hbm [shape: f32[8,16], index: 1, kind: input, shape index: {}]   ;;  %s247_s2 = inlined_call_operand.hbm [shape: f32[1,8,128], index: 2, kind: output, shape index: {}]  }
   0x1   :  { %8 = vsyncpa [#allocation7], 0 }
   0x2   :  { %9 = vsyncpa [#allocation5], 0  ;;  %s211_s9 = smov [#allocation3]   ;;  %s212_s11 = smov [#allocation6]  }
   0x3   :  { %s21_s10 = sshll.u32 %s211_s9, 4  ;;  %s36_s12 = sshll.u32 %s212_s11, 4  ;;  %s22_s10 = int_to_ptr.vmem [resolvable:$true] %s21_s10  ;;  %s37_s12 = int_to_ptr.vmem [resolvable:$true] %s36_s12 }
   0x4   :  { %s153_s13 = scalar_lea.vmem %s22_s10, 128  ;;  %p158_p1 = scmp.lt.s32.totalorder %s22_s10, %s22_s10 }
   0x5   :  { %p154_p0 = scmp.ne.s32.totalorder %s22_s10, %s153_s13  ;;  %p159_p2 = scmp.lt.s32.totalorder %s153_s13, %s153_s13 }
   0x7   :  { %p160_p3 = por %p159_p2, %p158_p1 }
   0x9   :  { %p161_p4 = pnand %p160_p3, %p154_p0 }
   0xb   :  { %164 = shalt.err (!%p161_p4)
}
   0xc   :  { %24 = dma.hbm_to_vmem [thread:$0]  %s245_s0, 128, %s22_s10, [#allocation4]  }
   0xd   :  { %s173_s16 = scalar_lea.vmem %s37_s12, 128  ;;  %p178_p6 = scmp.lt.s32.totalorder %s37_s12, %s37_s12 }
   0xe   :  { %p174_p5 = scmp.ne.s32.totalorder %s37_s12, %s173_s16  ;;  %p179_p7 = scmp.lt.s32.totalorder %s173_s16, %s173_s16 }
  0x10   :  { %p180_p8 = por %p179_p7, %p178_p6 }
  0x12   :  { %p181_p9 = pnand %p180_p8, %p174_p5 }
  0x14   :  { %184 = shalt.err (!%p181_p9)
}
  0x15   :  { %39 = dma.hbm_to_vmem [thread:$0]  %s246_s1, 128, %s37_s12, [#allocation7]  }
  0x16   :  { %205 = dma.done.wait [#allocation4], 128  }
  0x17   :  { %206 = vsyncadd [#allocation4], 4294967168 }
  0x18   :  { %207 = dma.done.wait [#allocation7], 128  }
  0x19   :  { %208 = vsyncadd [#allocation7], 4294967168  ;;  %vm60_vm0 = vcmask 130048   ;;  %v58_v0 = vld [vmem:[#allocation6] sm:$0xff]  ;;  %vm56_vm1 = vcmask 7168   ;;  %v213_v7 = vmov 0.0  }
  0x1a   :  { %v61_v1 = vsel %vm60_vm0, %v58_v0, -inf  ;;  %57 = vst.msk [vmem:[#allocation2] sm:$0xff] %vm56_vm1, %v213_v7  ;;  %v59_v12 = vld [vmem:[#allocation3] sm:$0xff]  ;;  %s214_s0 = smov [#allocation8]  }
  0x1b   :  { %62 = vmax.xlane.f32.xlu0 %v61_v1  ;;  %v77_v16 = vsub.f32 0.0, %v59_v12  ;;  %s119_s1 = sshll.u32 %s214_s0, 4  ;;  %s120_s1 = int_to_ptr.vmem [resolvable:$true] %s119_s1 }
  0x1c   :  { %s185_s21 = scalar_lea.vmem %s120_s1, 128  ;;  %p190_p11 = scmp.lt.s32.totalorder %s120_s1, %s120_s1 }
  0x1d   :  { %p186_p10 = scmp.ne.s32.totalorder %s120_s1, %s185_s21  ;;  %p191_p12 = scmp.lt.s32.totalorder %s185_s21, %s185_s21 }
  0x1f   :  { %p192_p13 = por %p191_p12, %p190_p11 }
  0x21   :  { %v90_v20 = vld [vmem:[#allocation2] sm:$0xff]  ;;  %p193_p0 = pnand %p192_p13, %p186_p10 }
  0xa4   :  { %v63_v2 = vpop.xlane.xlu0 %62 }
  0xa5   :  { %v64_v3 = vsub.f32 %v58_v0, %v63_v2 }
  0xa7   :  { %v65_v4 = vmul.f32 1.442695, %v64_v3 }
  0xa9   :  { %139 = vpow2.f32 %v65_v4 }
  0xb6   :  { %v140_v5 = vpop.eup %139 }
  0xb7   :  { %v67_v6 = vsel %vm60_vm0, %v140_v5, 0.0 }
  0xb8   :  { %68 = vadd.xlane.f32.xlu0 %v67_v6 }
 0x141   :  { %v69_v8 = vpop.xlane.xlu0 %68 }
 0x142   :  { %v70_v9 = vmul.f32 1e-05, %v69_v8  ;;  %141 = vlog2.f32 %v69_v8 }
 0x144   :  { %v71_v10 = vadd.f32 %v140_v5, %v70_v9 }
 0x146   :  { %143 = vlog2.f32 %v71_v10 }
 0x14f   :  { %v142_v11 = vpop.eup %141 }
 0x150   :  { %v75_v14 = vmul.f32 0.6931472, %v142_v11 }
 0x153   :  { %v144_v13 = vpop.eup %143 }
 0x154   :  { %v73_v15 = vmul.f32 0.6931472, %v144_v13 }
 0x156   :  { %v76_v17 = vsub.f32 %v73_v15, %v75_v14 }
 0x158   :  { %v78_v18 = vmul.f32 %v77_v16, %v76_v17 }
 0x15a   :  { %v79_v19 = vsel %vm60_vm0, %v78_v18, 0.0 }
 0x15b   :  { %80 = vadd.xlane.f32.xlu1 %v79_v19 }
 0x1e4   :  { %v81_v21 = vpop.xlane.xlu1 %80 }
 0x1e5   :  { %v91_v22 = vadd.f32 %v90_v20, %v81_v21 }
 0x1e7   :  { %93 = vst.msk [vmem:[#allocation2] sm:$0xff] %vm56_vm1, %v91_v22 }
 0x1ee   :  { %v97_v23 = vld [vmem:[#allocation2] sm:$0xff] }
 0x1ef   :  { %v98_v24 = vsel %vm56_vm1, %v97_v23, 0.0 }
 0x1f0   :  { %99 = vadd.xlane.f32.xlu1 %v98_v24 }
 0x279   :  { %v100_v25 = vpop.xlane.xlu1 %99 }
 0x27a   :  { %v101_v26 = vrot.slane %v100_v25, 4 }
 0x27c   :  { %v102_v27 = vadd.f32 %v101_v26, %v100_v25 }
 0x27e   :  { %v103_v28 = vrot.slane %v102_v27, 2 }
 0x280   :  { %v104_v29 = vadd.f32 %v103_v28, %v102_v27 }
 0x282   :  { %v105_v30 = vrot.slane %v104_v29, 1 }
 0x284   :  { %v106_v31 = vadd.f32 %v105_v30, %v104_v29 }
 0x286   :  { %133 = vpush %v106_v31 }
 0x2b7   :  { %s134_s19 = spop %133 }
 0x2b8   :  { %s110_s20 = smul.f32 0.125, %s134_s19 }
 0x2ba   :  { %v111_v32 = vstv %s110_s20 }
 0x2bb   :  { %112 = vst [vmem:[#allocation8] sm:$0xff] %v111_v32 }
 0x2bc   :  { %196 = shalt.err (!%p193_p0)
}
 0x2bd   :  { %122 = dma.vmem_to_hbm [thread:$0]  %s120_s1, 128, %s247_s2, [#allocation5]  }
 0x2be   :  { %209 = dma.done.wait [#allocation5], 128  }
 0x2bf   :  { %210 = vsyncadd [#allocation5], 4294967168 }
 0x2c0   :  { %126 = vsyncpa [#allocation4], 1 }
 0x2c1   :  { %127 = vsyncpa [#allocation7], 1 }
 0x2c2   :  { %128 = vsyncpa [#allocation5], 1 }

</bundles_post_ra>
